<compile_context>
chip_gen: v7x
topology: tpu7x:2x2x1
jax: 0.10.0
libtpu: 0.0.40
codegen_flags: <defaults>
</compile_context>

<pallas_src>
import functools

import jax
import jax.numpy as jnp
from jax import lax
from jax.experimental import pallas as pl
from jax.experimental.pallas import tpu as pltpu


# Explicit scoped-VMEM limit: safe on v5e/v6e (128 MiB physical) and leaves
# headroom on v7x (64 MiB physical).  Tile sizes below stay well under this.
_VMEM_LIMIT_BYTES = 32 * 1024 * 1024


def _pick_tile(dim, candidates):
    """Largest candidate tile that evenly divides `dim`, else the full dim."""
    for c in candidates:
        if c <= dim and dim % c == 0:
            return c
    return dim


# --------------------------- Conv1D (x @ W + b) ----------------------------- #

def _linear_kernel(x_ref, w_ref, b_ref, o_ref, acc_ref):
    k = pl.program_id(2)

    @pl.when(k == 0)
    def _init():
        acc_ref[...] = jnp.zeros(acc_ref.shape, acc_ref.dtype)

    acc_ref[...] += jnp.dot(x_ref[...], w_ref[...],
                            preferred_element_type=jnp.float32)

    @pl.when(k == pl.num_programs(2) - 1)
    def _finalize():
        o_ref[...] = (acc_ref[...] + b_ref[...].astype(jnp.float32)
                      ).astype(o_ref.dtype)


def conv1d(x2d, w, b):
    """x2d: (M, K), w: (K, N), b: (N,) -> (M, N), tiled + double-buffered."""
    M, K = x2d.shape
    N = w.shape[1]
    tm = _pick_tile(M, (256, 128, 64, 32, 16, 8))
    tn = _pick_tile(N, (256, 128))
    tk = _pick_tile(K, (512, 256, 128))
    grid = (M // tm, N // tn, K // tk)
    return pl.pallas_call(
        _linear_kernel,
        out_shape=jax.ShapeDtypeStruct((M, N), x2d.dtype),
        grid_spec=pltpu.PrefetchScalarGridSpec(
            num_scalar_prefetch=0,
            grid=grid,
            in_specs=[
                pl.BlockSpec((tm, tk), lambda i, j, k: (i, k)),
                pl.BlockSpec((tk, tn), lambda i, j, k: (k, j)),
                pl.BlockSpec((1, tn), lambda i, j, k: (0, j)),
            ],
            out_specs=pl.BlockSpec((tm, tn), lambda i, j, k: (i, j)),
            scratch_shapes=[pltpu.VMEM((tm, tn), jnp.float32)],
        ),
        compiler_params=pltpu.CompilerParams(
            dimension_semantics=("parallel", "parallel", "arbitrary"),
            vmem_limit_bytes=_VMEM_LIMIT_BYTES),
    )(x2d, w, b.reshape(1, N))


# ------------------ fused causal attention (flash-style) -------------------- #

def _flash_attn_kernel(q_ref, k_ref, v_ref, o_ref,
                       m_scr, l_scr, acc_scr, qh_scr,
                       *, n_head, dh, scale, tq, tk):
    qi = pl.program_id(1)
    ki = pl.program_id(2)

    @pl.when(ki == 0)
    def _init():
        m_scr[...] = jnp.full(m_scr.shape, -jnp.inf, dtype=m_scr.dtype)
        l_scr[...] = jnp.zeros(l_scr.shape, l_scr.dtype)
        acc_scr[...] = jnp.zeros(acc_scr.shape, acc_scr.dtype)
        # Split q into heads (and fold in 1/sqrt(dh)) once per q block;
        # reused across all KV blocks.
        q = q_ref[...]                                        # (tq, C)
        for h in range(n_head):                               # static unroll
            q_h = q[:, h * dh:(h + 1) * dh]                   # (tq, dh)
            if scale:
                q_h = q_h * jnp.asarray(dh ** -0.5, dtype=q_h.dtype)
            qh_scr[h] = q_h

    # Causal block skip: this KV block contributes only if it intersects the
    # lower-triangular region of the (T, T) score matrix.
    @pl.when(ki * tk < (qi + 1) * tq)
    def _compute():
        k = k_ref[...]                                        # (tk, C)
        v = v_ref[...]                                        # (tk, C)
        row = qi * tq + lax.broadcasted_iota(jnp.int32, (tq, tk), 0)
        col = ki * tk + lax.broadcasted_iota(jnp.int32, (tq, tk), 1)
        causal = col <= row                                   # shared across heads

        for h in range(n_head):                               # static unroll
            k_h = k[:, h * dh:(h + 1) * dh]                   # (tk, dh)
            v_h = v[:, h * dh:(h + 1) * dh]                   # (tk, dh)
            # s = q_h @ k_h^T without materializing a transpose of k_h.
            s = lax.dot_general(qh_scr[h], k_h,
                                (((1,), (1,)), ((), ())),
                                preferred_element_type=jnp.float32)  # (tq, tk)
            s = jnp.where(causal, s, jnp.float32(-10000.0))   # masked_bias fill

            m_prev = m_scr[h]                                 # (tq, 1)
            m_new = jnp.maximum(m_prev, jnp.max(s, axis=-1, keepdims=True))
            alpha = jnp.exp(m_prev - m_new)
            p = jnp.exp(s - m_new)                            # f32 softmax math
            l_scr[h] = alpha * l_scr[h] + jnp.sum(p, axis=-1, keepdims=True)
            acc_scr[h] = alpha * acc_scr[h] + jnp.dot(
                p.astype(v_h.dtype), v_h, preferred_element_type=jnp.float32)
            m_scr[h] = m_new

    @pl.when(ki == pl.num_programs(2) - 1)
    def _finalize():
        inv_l = pl.reciprocal(l_scr[...], approx=True)        # EUP slot (H, tq, 1)
        outs = [(acc_scr[h] * inv_l[h]).astype(o_ref.dtype) for h in range(n_head)]
        # Single lane-dense (tq, C) store — merge_heads fused into the layout.
        o_ref[...] = jnp.concatenate(outs, axis=-1)


def fused_causal_attention(qkv, *, n_head, scale):
    """qkv: (B, T, 3C) fused projections -> (B, T, C) attention output."""
    B, T, C3 = qkv.shape
    C = C3 // 3
    dh = C // n_head
    # Blocks of width C along the fused channel dim must be lane-aligned.
    # TODO(synk): add a fallback path for C % 128 != 0 (e.g. GPT-2 XL, C=1600).
    assert C % 128 == 0, "n_state must be a multiple of 128 for the fused qkv path"

    tq = _pick_tile(T, (256, 128, 64, 32, 16, 8))
    tk = _pick_tile(T, (256, 128, 64, 32, 16, 8))
    grid = (B, T // tq, T // tk)

    kern = functools.partial(_flash_attn_kernel, n_head=n_head, dh=dh,
                             scale=scale, tq=tq, tk=tk)
    return pl.pallas_call(
        kern,
        out_shape=jax.ShapeDtypeStruct((B, T, C), qkv.dtype),
        grid_spec=pltpu.PrefetchScalarGridSpec(
            num_scalar_prefetch=0,
            grid=grid,
            in_specs=[
                # q / k / v are blocks 0 / 1 / 2 along the fused channel dim.
                pl.BlockSpec((None, tq, C), lambda b, qi, ki: (b, qi, 0)),
                pl.BlockSpec((None, tk, C), lambda b, qi, ki: (b, ki, 1)),
                pl.BlockSpec((None, tk, C), lambda b, qi, ki: (b, ki, 2)),
            ],
            out_specs=pl.BlockSpec((None, tq, C), lambda b, qi, ki: (b, qi, 0)),
            scratch_shapes=[
                pltpu.VMEM((n_head, tq, 1), jnp.float32),    # running max   m
                pltpu.VMEM((n_head, tq, 1), jnp.float32),    # running sum   l
                pltpu.VMEM((n_head, tq, dh), jnp.float32),   # output accumulator
                pltpu.VMEM((n_head, tq, dh), qkv.dtype),     # pre-scaled q heads
            ],
        ),
        compiler_params=pltpu.CompilerParams(
            dimension_semantics=("parallel", "parallel", "arbitrary"),
            vmem_limit_bytes=_VMEM_LIMIT_BYTES),
    )(qkv, qkv, qkv)


# --------------------------- SelfAttention forward -------------------------- #

def self_attention_forward(x, params, *, n_head, scale):
    """x: (B, T, C).  Returns the module's attention output `a` of shape (B, T, C)."""
    B, T, C = x.shape
    qkv = conv1d(x.reshape(B * T, C), params["w_attn"], params["b_attn"])
    a = fused_causal_attention(qkv.reshape(B, T, 3 * C), n_head=n_head, scale=scale)
    out = conv1d(a.reshape(B * T, C), params["w_proj"], params["b_proj"])
    return out.reshape(B, T, C)
    # TODO(synk): attn_dropout / resid_dropout are identity in eval mode; the
    # layer_past / use_cache / attention_mask / output_attentions branches of
    # the PyTorch forward are not implemented (forward defaults).


# ------------------------------ pure-JAX reference --------------------------- #

def reference_forward(x, params, *, n_head, scale):
    B, T, C = x.shape
    Dh = C // n_head
    qkv = x @ params["w_attn"] + params["b_attn"]
    q, k, v = jnp.split(qkv, 3, axis=2)

    def sh(t):
        return t.reshape(B, T, n_head, Dh).transpose(0, 2, 1, 3)

    q, k, v = sh(q), sh(k), sh(v)
    w = jnp.einsum("bhqd,bhkd->bhqk", q, k)
    if scale:
        w = w / jnp.float32(Dh) ** 0.5
    mask = jnp.tril(jnp.ones((T, T), dtype=bool))[None, None]
    w = jnp.where(mask, w, jnp.float32(-10000.0))
    w = jax.nn.softmax(w, axis=-1)
    a = jnp.einsum("bhqk,bhkd->bhqd", w, v)
    a = a.transpose(0, 2, 1, 3).reshape(B, T, C)
    return a @ params["w_proj"] + params["b_proj"]


# ------------------------------------ main ----------------------------------- #

if __name__ == "__main__":
    B, T, C, H = 2, 16, 128, 4          # batch, seq (n_ctx), n_state (nx), n_head
    SCALE = True

    key = jax.random.PRNGKey(0)
    kx, kw1, kb1, kw2, kb2 = jax.random.split(key, 5)

    x = jax.random.normal(kx, (B, T, C), dtype=jnp.float32)
    params = {
        # Conv1D(n_state*3, nx): weight (nx, 3*nx), bias (3*nx,)
        "w_attn": 0.02 * jax.random.normal(kw1, (C, 3 * C), dtype=jnp.float32),
        "b_attn": 0.01 * jax.random.normal(kb1, (3 * C,), dtype=jnp.float32),
        # Conv1D(n_state, nx): weight (nx, nx), bias (nx,)
        "w_proj": 0.02 * jax.random.normal(kw2, (C, C), dtype=jnp.float32),
        "b_proj": 0.01 * jax.random.normal(kb2, (C,), dtype=jnp.float32),
    }

    ref = reference_forward(x, params, n_head=H, scale=SCALE)

    # f32 path (tolerance slack covers the EUP approx reciprocal in softmax).
    out = jax.block_until_ready(
        self_attention_forward(x, params, n_head=H, scale=SCALE))
    assert out.shape == (B, T, C)
    assert jnp.allclose(out, ref, atol=1e-3, rtol=1e-3), "f32 mismatch vs reference"

    # bf16 MXU-operand path (production setting for v6e/v7x); loose tolerance.
    x_bf = x.astype(jnp.bfloat16)
    params_bf = {k: v.astype(jnp.bfloat16) for k, v in params.items()}
    out_bf = jax.block_until_ready(
        self_attention_forward(x_bf, params_bf, n_head=H, scale=SCALE))
    assert jnp.allclose(out_bf.astype(jnp.float32), ref, atol=2e-2, rtol=2e-2), \
        "bf16 mismatch vs reference"

    print("KERNEL_OK")
</pallas_src>

<mosaic_0001>
module attributes {stable_mosaic.version = 11 : i64} {
  func.func @_linear_kernel(%arg0: i32, %arg1: i32, %arg2: i32, %arg3: memref<32x128xf32, #tpu.memory_space<vmem>>, %arg4: memref<128x128xf32, #tpu.memory_space<vmem>>, %arg5: memref<1x128xf32, #tpu.memory_space<vmem>>, %arg6: memref<32x128xf32, #tpu.memory_space<vmem>>, %arg7: memref<32x128xf32, #tpu.memory_space<vmem>>) attributes {dimension_semantics = [#tpu.dimension_semantics<parallel>, #tpu.dimension_semantics<parallel>, #tpu.dimension_semantics<arbitrary>], iteration_bounds = array<i64: 1, 3, 1>, scalar_prefetch = 0 : i64, scratch_operands = 1 : i64, tpu.core_type = #tpu.core_type<tc>, window_params = [{transform_indices = @transform_0, window_bounds = array<i64: 32, 128>}, {transform_indices = @transform_1, window_bounds = array<i64: 128, 128>}, {transform_indices = @transform_2, window_bounds = array<i64: 1, 128>}, {transform_indices = @transform_3, window_bounds = array<i64: 32, 128>}]} {
    %c0_i32 = arith.constant 0 : i32
    %0 = arith.cmpi eq, %arg2, %c0_i32 : i32
    %1 = arith.extui %0 : i1 to i32
    %c0_i32_0 = arith.constant 0 : i32
    %2 = arith.cmpi ne, %1, %c0_i32_0 : i32
    scf.if %2 {
      %cst_10 = arith.constant 0.000000e+00 : f32
      %12 = vector.broadcast %cst_10 : f32 to vector<32x128xf32>
      %c0_11 = arith.constant 0 : index
      %c0_12 = arith.constant 0 : index
      %13 = vector.load %arg7[%c0_11, %c0_12] : memref<32x128xf32, #tpu.memory_space<vmem>>, vector<32x128xf32>
      tpu.vector_store %arg7[%c0_11, %c0_12], %12 {strides = array<i32>} : memref<32x128xf32, #tpu.memory_space<vmem>>, vector<32x128xf32>,
    } else {
    }
    %c0 = arith.constant 0 : index
    %c0_1 = arith.constant 0 : index
    %3 = vector.load %arg7[%c0, %c0_1] : memref<32x128xf32, #tpu.memory_space<vmem>>, vector<32x128xf32>
    %c0_2 = arith.constant 0 : index
    %c0_3 = arith.constant 0 : index
    %4 = vector.load %arg3[%c0_2, %c0_3] : memref<32x128xf32, #tpu.memory_space<vmem>>, vector<32x128xf32>
    %c0_4 = arith.constant 0 : index
    %c0_5 = arith.constant 0 : index
    %5 = vector.load %arg4[%c0_4, %c0_5] : memref<128x128xf32, #tpu.memory_space<vmem>>, vector<128x128xf32>
    %cst = arith.constant dense<0.000000e+00> : vector<32x128xf32>
    %6 = tpu.matmul %4, %5, %cst {dimension_numbers = #tpu.dot_dimension_numbers<[1], [0], [0], [1], [0, 0, 1, 1], [], []>} : vector<32x128xf32>, vector<128x128xf32>, vector<32x128xf32> -> vector<32x128xf32>
    %7 = arith.addf %3, %6 : vector<32x128xf32>
    %c0_6 = arith.constant 0 : index
    %c0_7 = arith.constant 0 : index
    %8 = vector.load %arg7[%c0_6, %c0_7] : memref<32x128xf32, #tpu.memory_space<vmem>>, vector<32x128xf32>
    tpu.vector_store %arg7[%c0_6, %c0_7], %7 {strides = array<i32>} : memref<32x128xf32, #tpu.memory_space<vmem>>, vector<32x128xf32>,
    %c0_i32_8 = arith.constant 0 : i32
    %9 = arith.cmpi eq, %arg2, %c0_i32_8 : i32
    %10 = arith.extui %9 : i1 to i32
    %c0_i32_9 = arith.constant 0 : i32
    %11 = arith.cmpi ne, %10, %c0_i32_9 : i32
    scf.if %11 {
      %c0_10 = arith.constant 0 : index
      %c0_11 = arith.constant 0 : index
      %12 = vector.load %arg7[%c0_10, %c0_11] : memref<32x128xf32, #tpu.memory_space<vmem>>, vector<32x128xf32>
      %c0_12 = arith.constant 0 : index
      %c0_13 = arith.constant 0 : index
      %13 = vector.load %arg5[%c0_12, %c0_13] : memref<1x128xf32, #tpu.memory_space<vmem>>, vector<1x128xf32>
      %14 = vector.broadcast %13 : vector<1x128xf32> to vector<32x128xf32>
      %15 = arith.addf %12, %14 : vector<32x128xf32>
      %c0_14 = arith.constant 0 : index
      %c0_15 = arith.constant 0 : index
      %16 = vector.load %arg6[%c0_14, %c0_15] : memref<32x128xf32, #tpu.memory_space<vmem>>, vector<32x128xf32>
      tpu.vector_store %arg6[%c0_14, %c0_15], %15 {strides = array<i32>} : memref<32x128xf32, #tpu.memory_space<vmem>>, vector<32x128xf32>,
    } else {
    }
    return
  }
  func.func @transform_0(%arg0: i32, %arg1: i32, %arg2: i32) -> (i32, i32) {
    %c0_i32 = arith.constant 0 : i32
    return %arg0, %arg2 : i32, i32
  }
  func.func @transform_1(%arg0: i32, %arg1: i32, %arg2: i32) -> (i32, i32) {
    %c0_i32 = arith.constant 0 : i32
    return %arg2, %arg1 : i32, i32
  }
  func.func @transform_2(%arg0: i32, %arg1: i32, %arg2: i32) -> (i32, i32) {
    %c0_i32 = arith.constant 0 : i32
    %c0_i32_0 = arith.constant 0 : i32
    return %c0_i32, %arg1 : i32, i32
  }
  func.func @transform_3(%arg0: i32, %arg1: i32, %arg2: i32) -> (i32, i32) {
    %c0_i32 = arith.constant 0 : i32
    return %arg0, %arg1 : i32, i32
  }
}

</mosaic_0001>

<bundles_post_ra>
// kernel: tpu_custom_call.1
= control target key start
LH: loop header
LB: loop body
LE: loop exit
PB: predicated region body
PF: predicated region fallthrough
CT: control target
= control target key end

     0   :  { %8 = vsyncpa [#allocation4], 0  ;;  %s1149_s0 = inlined_call_operand.hbm [shape: f32[32,128], index: 0, kind: input, shape index: {}]   ;;  %s1150_s1 = inlined_call_operand.hbm [shape: f32[128,384], index: 1, kind: input, shape index: {}]   ;;  %s1151_s2 = inlined_call_operand.vmem [shape: f32[1,384], index: 2, kind: input, shape index: {}]   ;;  %s1152_s3 = inlined_call_operand.hbm [shape: f32[32,384], index: 3, kind: output, shape index: {}]  }
   0x1   :  { %9 = vsyncpa [#allocation7], 0 }
   0x2   :  { %11 = vsyncpa [#allocation7 + $0x1], 0 }
   0x3   :  { %12 = vsyncpa [#allocation5], 0 }
   0x4   :  { %14 = vsyncpa [#allocation5 + $0x1], 0  ;;  %s909_s12 = smov 0   ;;  %s911_s13 = smov 0  }
   0x5   :  { %s913_s14 = smov 0   ;;  %s915_s15 = smov 0  }
   0x6   :  { %s917_s16 = smov 0   ;;  %s919_s17 = smov 0  }
   0x7 LB: > { %s533_s18 = sadd.s32 4294967295, %s878_s17   ;;  %s534_s19 = sadd.s32 4294967294, %s878_s17   ;;  %s878_s17 = sphi %s919_s17, %s20_s17   ;;  %s874_s16 = sphi %s917_s16, %s1179_s16   ;;  %s870_s15 = sphi %s915_s15, %s1178_s15   ;;  %s866_s14 = sphi %s913_s14, %s1177_s14   ;;  %s862_s13 = sphi %s911_s13, %s1176_s13   ;;  %s858_s12 = sphi %s909_s12, %s1175_s12  }
   0x8   : > { %p83_p0 = scmp.ne.s32.totalorder %s866_s14, %s862_s13  ;;  %p84_p1 = scmp.eq.s32.totalorder %s878_s17, 0 }
   0x9   : > { %p89_p2 = scmp.ne.s32.totalorder %s862_s13, %s858_s12  ;;  %p946_p3 = scmp.eq.s32.totalorder %s533_s18, 0 }
   0xa   : > { %p950_p4 = por %p84_p1, %p83_p0  ;;  %p141_p5 = scmp.eq.s32.totalorder %s533_s18, 2 }
   0xb   : > { %s1160_s20 = scalar_select %p946_p3, 1, 0 }
   0xc   : > { %p956_p6 = por %p946_p3, %p89_p2  ;;  %p147_p7 = scmp.eq.s32.totalorder %s534_s19, 2 }
   0xd   : > { %p960_p8 = por %p141_p5, %p83_p0  ;;  %p535_p9 = scmp.ge.s32.totalorder %s878_s17, 1 }
   0xe   : > { %s1162_s22 = scalar_select %p956_p6, 1, 0 }
   0xf   : > { %s1163_s23 = scalar_select %p960_p8, 1, 0 }
  0x10   : > { %p965_p10 = por %p147_p7, %p89_p2  ;;  %p154_p11 = scmp.lt.s32.totalorder %s878_s17, 4 }
  0x11   : > { %s880_s26 = smov [#allocation3]   ;;  %p676_p0 = scmp.lt.s32.totalorder %s878_s17, 3 }
  0x12   : > { %s1164_s24 = scalar_select %p965_p10, 1, 0 }
  0x13   : > { %p970_p12 = pnand %p535_p9, %p154_p11  ;;  %s170_s27 = sshll.u32 %s880_s26, 4  ;;  %s171_s27 = int_to_ptr.vmem [resolvable:$true] %s170_s27 }
  0x14   : > { %p985_p2 = pnand %p676_p0, %p950_p4  ;;  %s35_s30 = sadd.s32 1, %s874_s16 }
  0x15   : > { %s1165_s25 = scalar_select %p970_p12, 1, 0 }
  0x16   : > { %p663_p13 = pneg %p970_p12  ;;  %s734_s6 = scalar_lea.hbm %s1149_s0, 512 }
  0x17   : > { %s1167_s29 = scalar_select %p985_p2, 1, 0 }
  0x18   : > { %p979_p1 = pnand %p663_p13, %p946_p3  ;;  %p735_p5 = scmp.ne.s32.totalorder %s1149_s0, %s734_s6 }
  0x19   : > { %p741_p4 = scmp.lt.u32.totalorder %s734_s6, %s1149_s0 }
  0x1a   : > { %p736_p7 = pneg %p979_p1 }
  0x1c   : > { %p737_p9 = pnand %p736_p7, %p735_p5 }
  0x1e   : > { %p738_p11 = pneg %p737_p9 }
  0x20   : > { %p743_p13 = pnand %p741_p4, %p738_p11 }
  0x22   : > { %746 = shalt.err (!%p743_p13)
}
  0x23   : > { %s747_s11 = scalar_lea.vmem %s171_s27, 512  ;;  %p755_p6 = scmp.lt.s32.totalorder %s171_s27, %s171_s27 }
  0x24   : > { %p748_p0 = scmp.ne.s32.totalorder %s171_s27, %s747_s11  ;;  %p756_p3 = scmp.lt.s32.totalorder %s747_s11, %s747_s11 }
  0x26   : > { %p750_p10 = pnand %p748_p0, %p736_p7  ;;  %p757_p12 = por %p756_p3, %p755_p6 }
  0x28   : > { %p751_p8 = pneg %p750_p10 }
  0x2a   : > { %p758_p2 = pnand %p757_p12, %p751_p8 }
  0x2c   : > { %761 = shalt.err (!%p758_p2)
}
  0x2d   : > { %s1159_s18 = smov 128   ;;  %s882_s19 = smov 8  }
  0x2e   : > { %666 = dma.hbm_to_vmem [thread:$0]  (!%p979_p1), %s1149_s0, 512, %s171_s27, [#allocation4], %s1159_s18, %s1159_s18, %s882_s19  }
  0x2f   : > { %p37_p10 = scmp.ge.s32.totalorder %s35_s30, 3  ;;  %s76_s4 = sadd.s32 1, %s866_s14 }
  0x30   : > { %s184_s5 = sand.u32 1, %s866_s14   ;;  %s539_s8 = sshll.u32 %s874_s16, 7 }
  0x31   : > { %s1181_s30 = smov (%p37_p10, %s35_s30), 0  ;;  %s538_s6 = sshll.u32 %s184_s5, 7 }
  0x32   : > { %s72_s7 = ssub.s32 %s874_s16, %s1181_s30  ;;  %s1019_s10 = scalar_lea.hbm %s1150_s1, %s539_s8 }
  0x33   : > { %p74_p3 = scmp.eq.s32.totalorder %s72_s7, 0  ;;  %s188_s27 = scalar_lea.vmem [#allocation6], %s538_s6 }
  0x34   : > { %s197_s11 = sshll.u32 %s188_s27, 4  ;;  %s1026_s26 = scalar_lea.sflag [#allocation7], %s184_s5  ;;  %s1024_s11 = int_to_ptr.vmem [resolvable:$true] %s197_s11 }
  0x35   : > { %s1022_s21 = scalar_select %p74_p3, %s866_s14, %s76_s4  }
  0x36   : > { %s762_s18 = scalar_lea.hbm %s1019_s10, 2048  ;;  %p1168_p8 = scmp.ne.s32.totalorder %s1167_s29, 0 }
  0x37   : > { %p763_p6 = scmp.ne.s32.totalorder %s1019_s10, %s762_s18  ;;  %s767_s28 = scalar_lea.hbm %s1150_s1, 6144 }
  0x38   : > { %p764_p12 = pneg %p1168_p8  ;;  %p768_p5 = scmp.lt.u32.totalorder %s1019_s10, %s1150_s1 }
  0x39   : > { %p769_p7 = scmp.lt.u32.totalorder %s767_s28, %s762_s18  ;;  %p771_p11 = scmp.lt.u32.totalorder %s762_s18, %s1019_s10 }
  0x3a   : > { %p765_p1 = pnand %p764_p12, %p763_p6 }
  0x3b   : > { %p770_p9 = por %p769_p7, %p768_p5 }
  0x3c   : > { %p766_p2 = pneg %p765_p1 }
  0x3d   : > { %p772_p4 = por %p771_p11, %p770_p9 }
  0x3f   : > { %p773_p13 = pnand %p772_p4, %p766_p2 }
  0x41   : > { %776 = shalt.err (!%p773_p13)
}
  0x42   : > { %s777_s4 = scalar_lea.vmem %s1024_s11, 2048  ;;  %s883_s5 = smov [#allocation6]  }
  0x43   : > { %p778_p0 = scmp.ne.s32.totalorder %s1024_s11, %s777_s4  ;;  %s782_s27 = sshll.u32 %s883_s5, 4  ;;  %s783_s27 = int_to_ptr.vmem [resolvable:$false] %s782_s27 }
  0x44   : > { %s784_s7 = scalar_lea.vmem %s783_s27, 4096  ;;  %p785_p6 = scmp.lt.s32.totalorder %s1024_s11, %s783_s27 }
  0x45   : > { %p780_p10 = pnand %p778_p0, %p764_p12  ;;  %p786_p1 = scmp.lt.s32.totalorder %s784_s7, %s777_s4 }
  0x47   : > { %p781_p3 = pneg %p780_p10  ;;  %p787_p5 = por %p786_p1, %p785_p6 }
  0x49   : > { %p788_p7 = pnand %p787_p5, %p781_p3 }
  0x4b   : > { %791 = shalt.err (!%p788_p7)
}
  0x4c   : > { %s884_s18 = smov 384   ;;  %s1169_s8 = smov 128  }
  0x4d   : > { %670 = dma.hbm_to_vmem [thread:$0]  (!%p1168_p8), %s1019_s10, 2048, %s1024_s11, %s1026_s26, %s884_s18, %s1169_s8, %s882_s19  }
  0x4e   : > { %p1170_p12 = scmp.ne.s32.totalorder %s1165_s25, 0 }
  0x4f   : > { %p1171_p2 = scmp.ne.s32.totalorder (!%p1170_p12), %s1160_s20, 0 }
  0x50   : > { %215 = sbr.rel (%p1170_p12) target bundleno = 358 (0x166), region = 32 }
  0x57   : > { %845 = dma.done.wait (%p1171_p2), [#allocation4], 512  }
  0x58   : > { %847 = vsyncadd (%p1171_p2), [#allocation4], 4294966784  ;;  %s1063_s28 = sand.u32 1, %s862_s13   ;;  %p1172_p8 = scmp.ne.s32.totalorder %s1162_s22, 0 }
  0x59   : > { %s542_s29 = sshll.u32 %s1063_s28, 7  ;;  %s222_s6 = scalar_lea.sflag [#allocation7], %s1063_s28 }
  0x5a   : > { %s1067_s9 = scalar_lea.vmem [#allocation6], %s542_s29 }
  0x5b   : > { %849 = dma.done.wait (%p1172_p8), %s222_s6, 2048  }
  0x5c   : > { %851 = vsyncadd (%p1172_p8), %s222_s6, 4294965248  ;;  %v273_v0 = vld [vmem:[%s1067_s9] sm:$0xff]  ;;  %v274_v1 = vld [vmem:[%s1067_s9 + $0x8] sm:$0xff]  ;;  %p253_p9 = scmp.lt.s32.totalorder %s870_s15, 2  ;;  %s543_s20 = sshll.u32 %s1063_s28, 5 }
  0x5d   : > { %v275_v2 = vld [vmem:[%s1067_s9 + $0x10] sm:$0xff]  ;;  %v607_v3 = vpack.c.bf16 %v274_v1, %v273_v0  ;;  %v276_v4 = vld [vmem:[%s1067_s9 + $0x18] sm:$0xff]  ;;  %v277_v6 = vld [vmem:[%s1067_s9 + $0x20] sm:$0xff]  ;;  %s250_s11 = scalar_lea.vmem [#allocation8], %s543_s20  ;;  %s546_s4 = sshll.u32 %s870_s15, 7 }
  0x5e   : > { %v611_v5 = vpack.c.bf16 %v276_v4, %v275_v2  ;;  %v278_v7 = vld [vmem:[%s1067_s9 + $0x28] sm:$0xff]  ;;  %v269_v9 = vld [vmem:[#allocation3] sm:$0xff]  ;;  %v271_v10 = vld [vmem:[#allocation3 + $0x10] sm:$0xff]  ;;  %s254_s22 = scalar_select %p253_p9, %s870_s15, 2 }
  0x5f   : > { %608 = vmatprep.subr.bf16.mxu0 %v607_v3  ;;  %639 = vmatprep.subr.bf16.mxu1 %v607_v3  ;;  %v615_v8 = vpack.c.bf16 %v278_v7, %v277_v6  ;;  %v279_v11 = vld [vmem:[%s1067_s9 + $0x30] sm:$0xff]  ;;  %v280_v12 = vld [vmem:[%s1067_s9 + $0x38] sm:$0xff]  ;;  %v281_v14 = vld [vmem:[%s1067_s9 + $0x40] sm:$0xff]  ;;  %s420_s26 = sshll.u32 %s250_s11, 4  ;;  %s1101_s7 = scalar_lea.hbm %s1152_s3, %s546_s4  ;;  %s1096_s26 = int_to_ptr.vmem [resolvable:$true] %s420_s26 }
  0x60   : > { %610 = vmatpush3.bf16.msra.mxu0 %v607_v3  ;;  %647 = vmatpush3.bf16.msra.mxu1 %v607_v3  ;;  %v619_v13 = vpack.c.bf16 %v280_v12, %v279_v11  ;;  %v282_v15 = vld [vmem:[%s1067_s9 + $0x48] sm:$0xff]  ;;  %v283_v17 = vld [vmem:[%s1067_s9 + $0x50] sm:$0xff]  ;;  %v284_v18 = vld [vmem:[%s1067_s9 + $0x58] sm:$0xff]  ;;  %s255_s10 = scalar_lea.vmem %s1151_s2, %s254_s22  ;;  %s405_s15 = scalar_lea.sflag [#allocation5], %s1063_s28 }
  0x61   : > { %612 = vmatprep.subr.bf16.mxu0 %v611_v5  ;;  %640 = vmatprep.subr.bf16.mxu1 %v611_v5  ;;  %v623_v16 = vpack.c.bf16 %v282_v15, %v281_v14  ;;  %v627_v19 = vpack.c.bf16 %v284_v18, %v283_v17  ;;  %v285_v20 = vld [vmem:[%s1067_s9 + $0x60] sm:$0xff]  ;;  %v286_v21 = vld [vmem:[%s1067_s9 + $0x68] sm:$0xff]  ;;  %v287_v23 = vld [vmem:[%s1067_s9 + $0x70] sm:$0xff]  ;;  %s792_s18 = scalar_lea.vmem %s1096_s26, 512  ;;  %p1173_p4 = scmp.ne.s32.totalorder %s1163_s23, 0 }
  0x62   : > { %601 = vmatprep.mubr.f32.mxu0 %v269_v9  ;;  %604 = vmatprep.mubr.f32.mxu1 %v271_v10  ;;  %v631_v22 = vpack.c.bf16 %v286_v21, %v285_v20  ;;  %v288_v24 = vld [vmem:[%s1067_s9 + $0x78] sm:$0xff]  ;;  %v270_v26 = vld [vmem:[#allocation3 + $0x8] sm:$0xff]  ;;  %v544_v28 = vld [vmem:[%s255_s10] ss:$0 sm:$0xff]  ;;  %p793_p11 = scmp.ne.s32.totalorder %s1096_s26, %s792_s18  ;;  %s885_s8 = smov [#allocation8]  }
  0x63   : > { %v635_v25 = vpack.c.bf16 %v288_v24, %v287_v23  ;;  %v272_v27 = vld [vmem:[#allocation3 + $0x18] sm:$0xff]  ;;  %s796_s29 = sshll.u32 %s885_s8, 4  ;;  %s797_s29 = int_to_ptr.vmem [resolvable:$false] %s796_s29 }
  0x64   : > { %614 = vmatpush3.bf16.msra.mxu0 %v611_v5  ;;  %648 = vmatpush3.bf16.msra.mxu1 %v611_v5  ;;  %p794_p13 = pnand %p793_p11, %p1173_p4  ;;  %s798_s6 = scalar_lea.vmem %s797_s29, 1024 }
  0x65   : > { %616 = vmatprep.subr.bf16.mxu0 %v615_v8  ;;  %641 = vmatprep.subr.bf16.mxu1 %v615_v8  ;;  %p799_p10 = scmp.lt.s32.totalorder %s1096_s26, %s797_s29  ;;  %p800_p3 = scmp.lt.s32.totalorder %s798_s6, %s792_s18 }
  0x66   : > { %p795_p0 = pneg %p794_p13 }
  0x67   : > { %p801_p6 = por %p800_p3, %p799_p10 }
  0x68   : > { %618 = vmatpush3.bf16.msra.mxu0 %v615_v8  ;;  %649 = vmatpush3.bf16.msra.mxu1 %v615_v8 }
  0x69   : > { %620 = vmatprep.subr.bf16.mxu0 %v619_v13  ;;  %642 = vmatprep.subr.bf16.mxu1 %v619_v13  ;;  %p802_p1 = pnand %p801_p6, %p795_p0 }
  0x6c   : > { %622 = vmatpush3.bf16.msra.mxu0 %v619_v13  ;;  %650 = vmatpush3.bf16.msra.mxu1 %v619_v13 }
  0x6d   : > { %624 = vmatprep.subr.bf16.mxu0 %v623_v16  ;;  %643 = vmatprep.subr.bf16.mxu1 %v623_v16 }
  0x70   : > { %626 = vmatpush3.bf16.msra.mxu0 %v623_v16  ;;  %651 = vmatpush3.bf16.msra.mxu1 %v623_v16 }
  0x71   : > { %628 = vmatprep.subr.bf16.mxu0 %v627_v19  ;;  %644 = vmatprep.subr.bf16.mxu1 %v627_v19 }
  0x74   : > { %630 = vmatpush3.bf16.msra.mxu0 %v627_v19  ;;  %652 = vmatpush3.bf16.msra.mxu1 %v627_v19 }
  0x75   : > { %632 = vmatprep.subr.bf16.mxu0 %v631_v22  ;;  %645 = vmatprep.subr.bf16.mxu1 %v631_v22 }
  0x78   : > { %634 = vmatpush3.bf16.msra.mxu0 %v631_v22  ;;  %653 = vmatpush3.bf16.msra.mxu1 %v631_v22 }
  0x79   : > { %636 = vmatprep.subr.bf16.mxu0 %v635_v25  ;;  %646 = vmatprep.subr.bf16.mxu1 %v635_v25 }
  0x7c   : > { %638 = vmatpush3.bf16.msra.mxu0 %v635_v25  ;;  %654 = vmatpush3.bf16.msra.mxu1 %v635_v25 }
  0x7f   : > { %602 = vmatmul.mubr.f32.vlgmr.msra.gmra.mrb[0].mxu0 %v270_v26  ;;  %605 = vmatmul.mubr.f32.vlgmr.msra.gmra.mrb[0].mxu1 %v272_v27 }
 0x152   : > { %v603_v29 = vpop.f32.mrb[0].mxu0  ;;  %v606_v30 = vpop.f32.mrb[0].mxu1 }
 0x153   : > { %v397_v31 = vadd.f32 %v603_v29, %v544_v28  ;;  %v399_v32 = vadd.f32 %v606_v30, %v544_v28  ;;  %v355_v33 = vpop.f32.mrb[1].mxu0  ;;  %v365_v34 = vpop.f32.mrb[1].mxu1 }
 0x154   : > { %v396_v35 = vadd.f32 %v544_v28, %v355_v33  ;;  %v398_v36 = vadd.f32 %v544_v28, %v365_v34 }
 0x155   : > { %401 = vst [vmem:[%s250_s11 + $0x8] sm:$0xff] %v397_v31  ;;  %403 = vst [vmem:[%s250_s11 + $0x18] sm:$0xff] %v399_v32 }
 0x156   : > { %400 = vst [vmem:[%s250_s11] sm:$0xff] %v396_v35  ;;  %402 = vst [vmem:[%s250_s11 + $0x10] sm:$0xff] %v398_v36 }
 0x157   : > { %805 = shalt.err (!%p802_p1)
}
 0x158   : > { %s806_s9 = scalar_lea.hbm %s1101_s7, 512  ;;  %s810_s25 = scalar_lea.hbm %s1152_s3, 1536 }
 0x159   : > { %p807_p5 = scmp.ne.s32.totalorder %s1101_s7, %s806_s9  ;;  %p811_p2 = scmp.lt.u32.totalorder %s1101_s7, %s1152_s3 }
 0x15a   : > { %p812_p8 = scmp.lt.u32.totalorder %s810_s25, %s806_s9  ;;  %p814_p11 = scmp.lt.u32.totalorder %s806_s9, %s1101_s7 }
 0x15b   : > { %p808_p7 = pnand %p807_p5, %p1173_p4 }
 0x15c   : > { %p813_p9 = por %p812_p8, %p811_p2 }
 0x15d   : > { %p809_p12 = pneg %p808_p7 }
 0x15e   : > { %p815_p13 = por %p814_p11, %p813_p9 }
 0x160   : > { %p816_p0 = pnand %p815_p13, %p809_p12 }
 0x162   : > { %819 = shalt.err (!%p816_p0)
}
 0x163   : > { %s886_s11 = smov 128   ;;  %s887_s4 = smov 384  }
 0x164   : > { %s888_s5 = smov 8  }
 0x165   : > { %661 = dma.vmem_to_hbm [thread:$0]  (%p1173_p4), %s1096_s26, 512, %s1101_s7, %s405_s15, %s886_s11, %s887_s4, %s888_s5  }
 0x166 PF: > { %p678_p10 = scmp.ge.s32.totalorder %s878_s17, 2  ;;  %s435_s27 = sand.u32 1, %s858_s12  }
 0x167   : > { %p1174_p3 = scmp.ne.s32.totalorder %s1164_s24, 0  ;;  %s436_s18 = scalar_lea.sflag [#allocation5], %s435_s27 }
 0x169   : > { %p672_p6 = pnand %p678_p10, %p1174_p3 }
 0x16b   : > { %853 = dma.done.wait (!%p672_p6), %s436_s18, 512  }
 0x16c   : > { %855 = vsyncadd (!%p672_p6), %s436_s18, 4294966784  ;;  %s20_s17 = sadd.s32 1, %s878_s17   ;;  %s1175_s12 = smov %s862_s13 }
 0x16d   : > { %p17_p1 = scmp.ge.s32.totalorder %s20_s17, 5   ;;  %s1176_s13 = smov %s866_s14 }
 0x16e   : > { %s1177_s14 = smov %s1022_s21  ;;  %s1178_s15 = smov %s874_s16 }
 0x16f   : > { %s1179_s16 = smov %s1181_s30  ;;  %19 = sbr.rel (!%p17_p1) target bundleno = 7 (0x7), region = 94 }
 0x176   :  { %441 = vsyncpa [#allocation4], 1 }
 0x177   :  { %443 = vsyncpa [#allocation4 + $0x1], 1 }
 0x178   :  { %444 = vsyncpa [#allocation7], 1 }
 0x179   :  { %446 = vsyncpa [#allocation7 + $0x1], 1 }
 0x17a   :  { %447 = vsyncpa [#allocation5], 1 }
 0x17b   :  { %449 = vsyncpa [#allocation5 + $0x1], 1 }

</bundles_post_ra>
